<compile_context>
chip_gen: v5e
topology: v5e:2x2
jax: 0.10.0
libtpu: 0.0.40
codegen_flags: <defaults>
</compile_context>

<pallas_src>
import functools

import jax
import jax.numpy as jnp
from jax.experimental import pallas as pl
from jax.experimental.pallas import tpu as pltpu


def _attention_gate_kernel(g_ref, x_ref, wg_ref, wx_ref, bgx_ref, wp_ref,
                           bp_ref, out_ref):
    # g_ref: (F_g, tn), x_ref: (F_l, tn) -- channels on sublanes, tokens on lanes.
    g1 = jnp.dot(wg_ref[...], g_ref[...], preferred_element_type=jnp.float32)
    x1 = jnp.dot(wx_ref[...], x_ref[...], preferred_element_type=jnp.float32)
    s = jnp.maximum(g1 + x1 + bgx_ref[...], 0.0)                 # ReLU, (F_int, tn)
    psi_lin = jnp.dot(wp_ref[...], s,
                      preferred_element_type=jnp.float32) + bp_ref[...]
    # exact sigmoid; pl.reciprocal keeps the 1/x off the critical VALU path
    psi = pl.reciprocal(1.0 + jnp.exp(-psi_lin))                 # (1, tn)
    out_ref[...] = (x_ref[...] * psi).astype(out_ref.dtype)      # lane-dense store


def _fold_bn(w, b, gamma, beta, mean, var, eps=1e-5):
    """Fold eval-mode BatchNorm into a 1x1 conv expressed as (C_in, C_out) matmul."""
    scale = gamma / jnp.sqrt(var + eps)                 # (C_out,)
    w_f = w * scale[None, :]                            # (C_in, C_out)
    b_f = (b - mean) * scale + beta                     # (C_out,)
    return w_f, b_f


def _round_up(a, b):
    return -(-a // b) * b


@functools.partial(jax.jit, static_argnames=("tn",))
def attention_block(g, x, params, *, tn=512):
    """g, x: NCHW float32 tensors. Returns x * psi(g, x) in NCHW."""
    B, F_l, H, W = x.shape
    if g.shape[2:] != x.shape[2:]:
        # Bilinear resize of the gating signal (align_corners=False semantics),
        # done in XLA outside the Pallas kernel.
        g = jax.image.resize(g, (g.shape[0], g.shape[1], H, W), method="bilinear")
    F_g = g.shape[1]
    F_int = params["wg"].shape[1]

    HW = H * W

    # Pick a lane (token) tile: multiple of 128, <= token count, sized to a
    # conservative cross-generation double-buffered VMEM budget (v7x: 64 MiB
    # physical / 32 MiB default scoped; v5e: 16 MiB default scoped).
    vmem_stream_budget = 32 * 1024 * 1024
    if HW <= 128:
        tn_eff = HW                                   # single, full-extent tile
    else:
        tn_eff = max(128, (min(tn, HW) // 128) * 128)
        while tn_eff > 128 and 2 * 4 * tn_eff * (F_g + 2 * F_l) > vmem_stream_budget:
            tn_eff = max(128, (tn_eff // 2) // 128 * 128)
    HW_pad = _round_up(HW, tn_eff)

    # Free contiguous reshapes (no transposes).
    g3 = g.reshape(B, F_g, HW)
    x3 = x.reshape(B, F_l, HW)
    if HW_pad != HW:
        pad = HW_pad - HW
        g3 = jnp.pad(g3, ((0, 0), (0, 0), (0, pad)))
        x3 = jnp.pad(x3, ((0, 0), (0, 0), (0, pad)))

    # Fold BN into the 1x1 convs (eval-mode semantics), transpose the tiny
    # weights to (C_out, C_in) for the channels-on-sublanes layout, and
    # pre-sum the two branch biases (only g1 + x1 is ever used).
    wg, bg = _fold_bn(params["wg"], params["bg"], params["gn_g_gamma"],
                      params["gn_g_beta"], params["gn_g_mean"], params["gn_g_var"])
    wx, bx = _fold_bn(params["wx"], params["bx"], params["gn_x_gamma"],
                      params["gn_x_beta"], params["gn_x_mean"], params["gn_x_var"])
    wp, bp = _fold_bn(params["wp"], params["bp"], params["gn_p_gamma"],
                      params["gn_p_beta"], params["gn_p_mean"], params["gn_p_var"])

    wg_t = wg.T                                  # (F_int, F_g)
    wx_t = wx.T                                  # (F_int, F_l)
    bgx = (bg + bx).reshape(F_int, 1)            # fused branch bias
    wp_t = wp.T                                  # (1, F_int)
    bp2 = bp.reshape(1, 1)

    tok = lambda b, j: (b, 0, j)
    full = lambda b, j: (0, 0)

    # Explicit scoped-VMEM limit: double-buffered g/x/out streams + weights,
    # with a floor of 32 MiB and a v7x-safe ceiling of 48 MiB.
    stream_bytes = 2 * 4 * tn_eff * (F_g + 2 * F_l)
    weight_bytes = 4 * (F_int * (F_g + F_l + 2) + 2)
    vmem_limit = int(min(48 << 20,
                         max(32 << 20, stream_bytes + 2 * weight_bytes + (2 << 20))))

    out3 = pl.pallas_call(
        _attention_gate_kernel,
        out_shape=jax.ShapeDtypeStruct((B, F_l, HW_pad), x.dtype),
        grid_spec=pltpu.PrefetchScalarGridSpec(
            num_scalar_prefetch=0,
            grid=(B, HW_pad // tn_eff),
            in_specs=[
                pl.BlockSpec((None, F_g, tn_eff), tok),   # g tokens (F_g, tn)
                pl.BlockSpec((None, F_l, tn_eff), tok),   # x tokens (F_l, tn)
                pl.BlockSpec((F_int, F_g), full),         # Wg'
                pl.BlockSpec((F_int, F_l), full),         # Wx'
                pl.BlockSpec((F_int, 1), full),           # bg' + bx'
                pl.BlockSpec((1, F_int), full),           # Wpsi'
                pl.BlockSpec((1, 1), full),               # bpsi'
            ],
            out_specs=pl.BlockSpec((None, F_l, tn_eff), tok),
        ),
        compiler_params=pltpu.CompilerParams(
            dimension_semantics=("parallel", "parallel"),
            vmem_limit_bytes=vmem_limit),
    )(g3, x3, wg_t, wx_t, bgx, wp_t, bp2)

    out = out3[:, :, :HW].reshape(B, F_l, H, W)   # drop ragged-tail padding
    return out


def init_params(key, F_g, F_l, F_int):
    ks = jax.random.split(key, 12)
    p = {
        # 1x1 conv weights stored as (C_in, C_out) matmul matrices.
        "wg": jax.random.normal(ks[0], (F_g, F_int), jnp.float32) * 0.1,
        "bg": jax.random.normal(ks[1], (F_int,), jnp.float32) * 0.1,
        "wx": jax.random.normal(ks[2], (F_l, F_int), jnp.float32) * 0.1,
        "bx": jax.random.normal(ks[3], (F_int,), jnp.float32) * 0.1,
        "wp": jax.random.normal(ks[4], (F_int, 1), jnp.float32) * 0.1,
        "bp": jax.random.normal(ks[5], (1,), jnp.float32) * 0.1,
        # BatchNorm (eval mode) parameters / running stats.
        "gn_g_gamma": 1.0 + 0.1 * jax.random.normal(ks[6], (F_int,), jnp.float32),
        "gn_g_beta": 0.1 * jax.random.normal(ks[7], (F_int,), jnp.float32),
        "gn_g_mean": 0.05 * jax.random.normal(ks[8], (F_int,), jnp.float32),
        "gn_g_var": jnp.abs(1.0 + 0.1 * jax.random.normal(ks[9], (F_int,), jnp.float32)),
        "gn_x_gamma": 1.0 + 0.1 * jax.random.normal(ks[10], (F_int,), jnp.float32),
        "gn_x_beta": 0.1 * jax.random.normal(ks[11], (F_int,), jnp.float32),
        "gn_x_mean": jnp.zeros((F_int,), jnp.float32),
        "gn_x_var": jnp.ones((F_int,), jnp.float32),
        "gn_p_gamma": jnp.ones((1,), jnp.float32),
        "gn_p_beta": jnp.zeros((1,), jnp.float32),
        "gn_p_mean": jnp.zeros((1,), jnp.float32),
        "gn_p_var": jnp.ones((1,), jnp.float32),
    }
    return p


def reference(g, x, params, eps=1e-5):
    """Plain-JAX reference matching the PyTorch forward (eval-mode BN)."""
    B, F_g, H, W = g.shape
    _, F_l, _, _ = x.shape
    g2 = jnp.transpose(g, (0, 2, 3, 1)).reshape(-1, F_g)
    x2 = jnp.transpose(x, (0, 2, 3, 1)).reshape(-1, F_l)

    def bn(y, gamma, beta, mean, var):
        return (y - mean) / jnp.sqrt(var + eps) * gamma + beta

    g1 = bn(g2 @ params["wg"] + params["bg"], params["gn_g_gamma"],
            params["gn_g_beta"], params["gn_g_mean"], params["gn_g_var"])
    x1 = bn(x2 @ params["wx"] + params["bx"], params["gn_x_gamma"],
            params["gn_x_beta"], params["gn_x_mean"], params["gn_x_var"])
    s = jnp.maximum(g1 + x1, 0.0)
    psi = jax.nn.sigmoid(bn(s @ params["wp"] + params["bp"], params["gn_p_gamma"],
                            params["gn_p_beta"], params["gn_p_mean"],
                            params["gn_p_var"]))
    out2 = x2 * psi
    return out2.reshape(B, H, W, F_l).transpose(0, 3, 1, 2)


if __name__ == "__main__":
    key = jax.random.PRNGKey(0)
    kg, kx, kp = jax.random.split(key, 3)

    B, F_g, F_l, F_int, H, W = 2, 4, 4, 8, 16, 16
    g = jax.random.normal(kg, (B, F_g, H, W), jnp.float32)
    x = jax.random.normal(kx, (B, F_l, H, W), jnp.float32)
    params = init_params(kp, F_g, F_l, F_int)

    out = attention_block(g, x, params)
    out = jax.block_until_ready(out)

    ref = reference(g, x, params)
    assert out.shape == x.shape
    assert jnp.allclose(out, ref, atol=2e-5, rtol=2e-5), "mismatch vs reference"
    print("KERNEL_OK")
</pallas_src>

<mosaic_0001>
module attributes {stable_mosaic.version = 11 : i64} {
  func.func @_attention_gate_kernel(%arg0: i32, %arg1: i32, %arg2: memref<1x4x256xf32, #tpu.memory_space<vmem>>, %arg3: memref<1x4x256xf32, #tpu.memory_space<vmem>>, %arg4: memref<8x4xf32, #tpu.memory_space<vmem>>, %arg5: memref<8x4xf32, #tpu.memory_space<vmem>>, %arg6: memref<8x1xf32, #tpu.memory_space<vmem>>, %arg7: memref<1x8xf32, #tpu.memory_space<vmem>>, %arg8: memref<1x1xf32, #tpu.memory_space<vmem>>, %arg9: memref<1x4x256xf32, #tpu.memory_space<vmem>>) attributes {dimension_semantics = [#tpu.dimension_semantics<parallel>, #tpu.dimension_semantics<parallel>], iteration_bounds = array<i64: 2, 1>, scalar_prefetch = 0 : i64, scratch_operands = 0 : i64, tpu.core_type = #tpu.core_type<tc>, window_params = [{transform_indices = @transform_0, window_bounds = array<i64: 1, 4, 256>}, {transform_indices = @transform_1, window_bounds = array<i64: 1, 4, 256>}, {pipeline_mode = #tpu.pipeline_mode<synchronous>, transform_indices = @transform_2, window_bounds = array<i64: 8, 4>}, {pipeline_mode = #tpu.pipeline_mode<synchronous>, transform_indices = @transform_3, window_bounds = array<i64: 8, 4>}, {pipeline_mode = #tpu.pipeline_mode<synchronous>, transform_indices = @transform_4, window_bounds = array<i64: 8, 1>}, {pipeline_mode = #tpu.pipeline_mode<synchronous>, transform_indices = @transform_5, window_bounds = array<i64: 1, 8>}, {pipeline_mode = #tpu.pipeline_mode<synchronous>, transform_indices = @transform_6, window_bounds = array<i64: 1, 1>}, {transform_indices = @transform_7, window_bounds = array<i64: 1, 4, 256>}]} {
    %c0 = arith.constant 0 : index
    %c0_0 = arith.constant 0 : index
    %0 = vector.load %arg4[%c0, %c0_0] : memref<8x4xf32, #tpu.memory_space<vmem>>, vector<8x4xf32>
    %c0_1 = arith.constant 0 : index
    %c0_2 = arith.constant 0 : index
    %c0_3 = arith.constant 0 : index
    %1 = vector.load %arg2[%c0_1, %c0_2, %c0_3] : memref<1x4x256xf32, #tpu.memory_space<vmem>>, vector<1x4x256xf32>
    %2 = vector.shape_cast %1 : vector<1x4x256xf32> to vector<4x256xf32>
    %cst = arith.constant dense<0.000000e+00> : vector<8x256xf32>
    %3 = tpu.matmul %0, %2, %cst {dimension_numbers = #tpu.dot_dimension_numbers<[1], [0], [0], [1], [0, 0, 1, 1], [], []>} : vector<8x4xf32>, vector<4x256xf32>, vector<8x256xf32> -> vector<8x256xf32>
    %c0_4 = arith.constant 0 : index
    %c0_5 = arith.constant 0 : index
    %4 = vector.load %arg5[%c0_4, %c0_5] : memref<8x4xf32, #tpu.memory_space<vmem>>, vector<8x4xf32>
    %c0_6 = arith.constant 0 : index
    %c0_7 = arith.constant 0 : index
    %c0_8 = arith.constant 0 : index
    %5 = vector.load %arg3[%c0_6, %c0_7, %c0_8] : memref<1x4x256xf32, #tpu.memory_space<vmem>>, vector<1x4x256xf32>
    %6 = vector.shape_cast %5 : vector<1x4x256xf32> to vector<4x256xf32>
    %cst_9 = arith.constant dense<0.000000e+00> : vector<8x256xf32>
    %7 = tpu.matmul %4, %6, %cst_9 {dimension_numbers = #tpu.dot_dimension_numbers<[1], [0], [0], [1], [0, 0, 1, 1], [], []>} : vector<8x4xf32>, vector<4x256xf32>, vector<8x256xf32> -> vector<8x256xf32>
    %8 = arith.addf %3, %7 : vector<8x256xf32>
    %c0_10 = arith.constant 0 : index
    %c0_11 = arith.constant 0 : index
    %9 = vector.load %arg6[%c0_10, %c0_11] : memref<8x1xf32, #tpu.memory_space<vmem>>, vector<8x1xf32>
    %10 = vector.broadcast %9 : vector<8x1xf32> to vector<8x256xf32>
    %11 = arith.addf %8, %10 : vector<8x256xf32>
    %cst_12 = arith.constant 0.000000e+00 : f32
    %12 = vector.broadcast %cst_12 : f32 to vector<8x256xf32>
    %13 = arith.maximumf %11, %12 : vector<8x256xf32>
    %c0_13 = arith.constant 0 : index
    %c0_14 = arith.constant 0 : index
    %14 = vector.load %arg7[%c0_13, %c0_14] : memref<1x8xf32, #tpu.memory_space<vmem>>, vector<1x8xf32>
    %cst_15 = arith.constant dense<0.000000e+00> : vector<1x256xf32>
    %15 = tpu.matmul %14, %13, %cst_15 {dimension_numbers = #tpu.dot_dimension_numbers<[1], [0], [0], [1], [0, 0, 1, 1], [], []>} : vector<1x8xf32>, vector<8x256xf32>, vector<1x256xf32> -> vector<1x256xf32>
    %c0_16 = arith.constant 0 : index
    %c0_17 = arith.constant 0 : index
    %16 = vector.load %arg8[%c0_16, %c0_17] : memref<1x1xf32, #tpu.memory_space<vmem>>, vector<1x1xf32>
    %17 = vector.broadcast %16 : vector<1x1xf32> to vector<1x256xf32>
    %18 = arith.addf %15, %17 : vector<1x256xf32>
    %cst_18 = arith.constant 0.000000e+00 : f32
    %19 = vector.broadcast %cst_18 : f32 to vector<1x256xf32>
    %20 = arith.subf %19, %18 : vector<1x256xf32>
    %21 = math.exp %20 : vector<1x256xf32>
    %cst_19 = arith.constant 1.000000e+00 : f32
    %22 = vector.broadcast %cst_19 : f32 to vector<1x256xf32>
    %23 = arith.addf %22, %21 : vector<1x256xf32>
    %24 = tpu.reciprocal %23 : vector<1x256xf32> -> vector<1x256xf32>
    %c0_20 = arith.constant 0 : index
    %c0_21 = arith.constant 0 : index
    %c0_22 = arith.constant 0 : index
    %25 = vector.load %arg3[%c0_20, %c0_21, %c0_22] : memref<1x4x256xf32, #tpu.memory_space<vmem>>, vector<1x4x256xf32>
    %26 = vector.shape_cast %25 : vector<1x4x256xf32> to vector<4x256xf32>
    %27 = vector.broadcast %24 : vector<1x256xf32> to vector<4x256xf32>
    %28 = arith.mulf %26, %27 : vector<4x256xf32>
    %c0_23 = arith.constant 0 : index
    %c0_24 = arith.constant 0 : index
    %c0_25 = arith.constant 0 : index
    %29 = vector.load %arg9[%c0_23, %c0_24, %c0_25] : memref<1x4x256xf32, #tpu.memory_space<vmem>>, vector<1x4x256xf32>
    %30 = vector.shape_cast %29 : vector<1x4x256xf32> to vector<4x256xf32>
    %31 = vector.shape_cast %28 : vector<4x256xf32> to vector<1x4x256xf32>
    tpu.vector_store %arg9[%c0_23, %c0_24, %c0_25], %31 {strides = array<i32>} : memref<1x4x256xf32, #tpu.memory_space<vmem>>, vector<1x4x256xf32>,
    return
  }
  func.func @transform_0(%arg0: i32, %arg1: i32) -> (i32, i32, i32) {
    %c0_i32 = arith.constant 0 : i32
    %c0_i32_0 = arith.constant 0 : i32
    return %arg0, %c0_i32, %arg1 : i32, i32, i32
  }
  func.func @transform_1(%arg0: i32, %arg1: i32) -> (i32, i32, i32) {
    %c0_i32 = arith.constant 0 : i32
    %c0_i32_0 = arith.constant 0 : i32
    return %arg0, %c0_i32, %arg1 : i32, i32, i32
  }
  func.func @transform_2(%arg0: i32, %arg1: i32) -> (i32, i32) {
    %c0_i32 = arith.constant 0 : i32
    %c0_i32_0 = arith.constant 0 : i32
    %c0_i32_1 = arith.constant 0 : i32
    return %c0_i32, %c0_i32_0 : i32, i32
  }
  func.func @transform_3(%arg0: i32, %arg1: i32) -> (i32, i32) {
    %c0_i32 = arith.constant 0 : i32
    %c0_i32_0 = arith.constant 0 : i32
    %c0_i32_1 = arith.constant 0 : i32
    return %c0_i32, %c0_i32_0 : i32, i32
  }
  func.func @transform_4(%arg0: i32, %arg1: i32) -> (i32, i32) {
    %c0_i32 = arith.constant 0 : i32
    %c0_i32_0 = arith.constant 0 : i32
    %c0_i32_1 = arith.constant 0 : i32
    return %c0_i32, %c0_i32_0 : i32, i32
  }
  func.func @transform_5(%arg0: i32, %arg1: i32) -> (i32, i32) {
    %c0_i32 = arith.constant 0 : i32
    %c0_i32_0 = arith.constant 0 : i32
    %c0_i32_1 = arith.constant 0 : i32
    return %c0_i32, %c0_i32_0 : i32, i32
  }
  func.func @transform_6(%arg0: i32, %arg1: i32) -> (i32, i32) {
    %c0_i32 = arith.constant 0 : i32
    %c0_i32_0 = arith.constant 0 : i32
    %c0_i32_1 = arith.constant 0 : i32
    return %c0_i32, %c0_i32_0 : i32, i32
  }
  func.func @transform_7(%arg0: i32, %arg1: i32) -> (i32, i32, i32) {
    %c0_i32 = arith.constant 0 : i32
    %c0_i32_0 = arith.constant 0 : i32
    return %arg0, %c0_i32, %arg1 : i32, i32, i32
  }
}

</mosaic_0001>

<bundles_post_ra>
// kernel: attention_block.1
= control target key start
LH: loop header
LB: loop body
LE: loop exit
PB: predicated region body
PF: predicated region fallthrough
CT: control target
= control target key end

     0   :  { %s804_s26 = smov 0   ;;  %s806_s27 = smov 0   ;;  %s866_s0 = inlined_call_operand.vmem [shape: f32[2,4,256], index: 0, kind: input, shape index: {}]   ;;  %s867_s1 = inlined_call_operand.vmem [shape: f32[2,4,256], index: 1, kind: input, shape index: {}]   ;;  %s868_s2 = inlined_call_operand.vmem [shape: f32[8,4], index: 2, kind: input, shape index: {}]   ;;  %s869_s3 = inlined_call_operand.vmem [shape: f32[8,4], index: 3, kind: input, shape index: {}]   ;;  %s870_s4 = inlined_call_operand.vmem [shape: f32[8,1], index: 4, kind: input, shape index: {}]   ;;  %s871_s5 = inlined_call_operand.vmem [shape: f32[1,8], index: 5, kind: input, shape index: {}]   ;;  %s872_s6 = inlined_call_operand.<no memory space> [shape: f32[1,1], index: 6, kind: input, shape index: {}]   ;;  %s873_s7 = inlined_call_operand.vmem [shape: f32[2,4,256], index: 7, kind: output, shape index: {}]  }
   0x1   :  { %v12_v0 = vstv %s872_s6  ;;  %s808_s28 = smov 0  }
   0x2   :  { %13 = vst [vmem:[#allocation2] sm:$0x1] %v12_v0 }
   0x3 LB: > { %s31_s6 = sadd.s32 1, %s754_s27  ;;  %p680_p0 = scmp.ge.s32.totalorder %s758_s28, 1  ;;  %s758_s28 = sphi %s808_s28, %s19_s28   ;;  %s754_s27 = sphi %s806_s27, %s875_s27   ;;  %s750_s26 = sphi %s804_s26, %s874_s26  }
   0x4   : > { %p33_p1 = scmp.ge.s32.totalorder %s31_s6, 2  ;;  %p277_p2 = scmp.lt.s32.totalorder %s758_s28, 3 }
   0x6   : > { %s877_s6 = smov (%p33_p1, %s31_s6), 0  ;;  %p278_p3 = pnand %p680_p0, %p277_p2 }
   0x7   : > { %p327_p4 = scmp.lt.s32.totalorder (!%p278_p3), %s750_s26, 1 }
   0x8   : > { %281 = sbr.rel (%p278_p3) target bundleno = 340 (0x154), region = 48 }
   0xd   : > { %v760_v1 = vmov 0   ;;  %v464_v2 = vld [vmem:[%s870_s4] sm:$0xff]  ;;  %s879_s26 = smov (!%p327_p4, %s750_s26), 1  ;;  %v475_v4 = vld [vmem:[#allocation2] sm:$0x1]  ;;  %vm368_vm0 = vcmask 1043456  }
   0xe   : > { %727 = vset.pattern.permute.xlu0 %v760_v1  ;;  %s825_s8 = sshll.u32 %s879_s26, 3  ;;  %v358_v6 = vld [vmem:[%s869_s3] sm:$0xff]  ;;  %vm364_vm1 = vcmask 31744   ;;  %vm482_vm2 = vcmask 64512  }
   0xf   : > { %467 = vperm.xlu0 %727, %v464_v2   ;;  %s344_s11 = scalar_lea.vmem %s867_s1, %s825_s8  ;;  %s334_s14 = scalar_lea.vmem %s866_s0, %s825_s8  ;;  %v356_v9 = vld [vmem:[%s868_s2] sm:$0xff] }
  0x10   : > { %v831_v3 = vld [vmem:[%s344_s11] sm:$0xff]  ;;  %s354_s23 = scalar_lea.vmem %s873_s7, %s825_s8 }
  0x11   : > { %361 = vst [vmem:[#allocation1] ss:$2 sm:$0xff] %v831_v3  ;;  %v357_v5 = vld [vmem:[%s334_s14] sm:$0xff] }
  0x12   : > { %v474_v23 = vld [vmem:[%s871_s5] sm:$0x1] }
  0x17   : > { %478 = vperm.xlu0 %727, %v475_v4  }
  0x18   : > { %v362_v7 = vld.sshfl [vmem:[#allocation1] sm:$0xff pattern:$0x75316420]  ;;  %v363_v8 = vld.sshfl [vmem:[#allocation1 + $0x8] sm:$0xff pattern:$0x75316420] }
  0x19   : > { %414 = vst [vmem:[#allocation1] ss:$2 sm:$0xff] %v357_v5  ;;  %687 = vmatpush.msk.msra.mxu0 %vm368_vm0, %v362_v7  ;;  %689 = vmatpush.msk.msra.mxu1 %vm368_vm0, %v363_v8 }
  0x1a   : > { %688 = vmatmul.msk.f32.vlgmr.msra.gmra.mxu0 %vm364_vm1, %v358_v6  ;;  %690 = vmatmul.msk.f32.vlgmr.msra.gmra.mxu1 %vm364_vm1, %v358_v6 }
  0x20   : > { %v415_v10 = vld.sshfl [vmem:[#allocation1] sm:$0xff pattern:$0x75316420]  ;;  %v416_v11 = vld.sshfl [vmem:[#allocation1 + $0x8] sm:$0xff pattern:$0x75316420] }
  0x21   : > { %691 = vmatpush.msk.msra.mxu2 %vm368_vm0, %v415_v10  ;;  %693 = vmatpush.msk.msra.mxu3 %vm368_vm0, %v416_v11 }
  0x22   : > { %692 = vmatmul.msk.f32.vlgmr.msra.gmra.mxu2 %vm364_vm1, %v356_v9  ;;  %694 = vmatmul.msk.f32.vlgmr.msra.gmra.mxu3 %vm364_vm1, %v356_v9 }
  0x81   : > { %v468_v18 = vpop.permute.xlu0 %467 }
  0x89   : > { %v479_v24 = vpop.permute.xlu0 %478 }
  0x8a   : > { %v481_v25 = vperm.slane %v479_v24, 0 }
  0x97   : > { %v390_v12 = vpop.f32.mrf.mxu0  ;;  %v410_v13 = vpop.f32.mrf.mxu1 }
  0xa5   : > { %v441_v14 = vpop.f32.mrf.mxu2  ;;  %v461_v15 = vpop.f32.mrf.mxu3 }
  0xa6   : > { %v442_v16 = vadd.f32 %v441_v14, %v390_v12  ;;  %v462_v17 = vadd.f32 %v461_v15, %v410_v13 }
  0xa8   : > { %v470_v19 = vadd.f32 %v468_v18, %v442_v16  ;;  %v471_v20 = vadd.f32 %v468_v18, %v462_v17 }
  0xaa   : > { %v472_v21 = vmax.f32 %v470_v19, 0.0  ;;  %v473_v22 = vmax.f32 %v471_v20, 0.0 }
  0xac   : > { %501 = vmatpush.msrb.mxu0 %v472_v21  ;;  %521 = vmatpush.msrb.mxu1 %v473_v22 }
  0xad   : > { %695 = vmatmul.msk.f32.vlgmr.msrb.gmra.mxu0 %vm482_vm2, %v474_v23  ;;  %696 = vmatmul.msk.f32.vlgmr.msrb.gmra.mxu1 %vm482_vm2, %v474_v23 }
 0x12a   : > { %v503_v26 = vpop.f32.mrf.mxu0  ;;  %v523_v27 = vpop.f32.mrf.mxu1 }
 0x12b   : > { %v504_v28 = vadd.f32 %v503_v26, %v481_v25  ;;  %v524_v29 = vadd.f32 %v523_v27, %v481_v25 }
 0x12d   : > { %v526_v30 = vsub.f32 0.0, %v504_v28  ;;  %v527_v31 = vsub.f32 0.0, %v524_v29 }
 0x12f   : > { %v528_v32 = vmul.f32 1.442695, %v526_v30  ;;  %v530_v33 = vmul.f32 1.442695, %v527_v31 }
 0x131   : > { %728 = vpow2.f32 %v528_v32 }
 0x132   : > { %730 = vpow2.f32 %v530_v33 }
 0x137   : > { %v729_v34 = vpop.eup %728 }
 0x138   : > { %v731_v35 = vpop.eup %730  ;;  %v532_v36 = vadd.f32 1.0, %v729_v34 }
 0x139   : > { %v533_v37 = vadd.f32 1.0, %v731_v35 }
 0x13a   : > { %732 = vrcp.f32 %v532_v36  ;;  %v545_v45 = vand.u32 2147483648, %v532_v36  ;;  %v543_v47 = vand.u32 2147483647, %v532_v36  ;;  %vm539_vm5 = vweird.f32 %v532_v36 }
 0x13b   : > { %734 = vrcp.f32 %v533_v37  ;;  %v559_v46 = vand.u32 2147483648, %v533_v37  ;;  %v557_v49 = vand.u32 2147483647, %v533_v37  ;;  %vm553_vm7 = vweird.f32 %v533_v37 }
 0x13c   : > { %v546_v53 = vor.u32 1.1754944e-38, %v545_v45  ;;  %vm544_vm9 = vcmp.eq.f32.partialorder %v543_v47, 8.507059e+37 }
 0x13d   : > { %v560_v54 = vor.u32 1.1754944e-38, %v559_v46  ;;  %vm558_vm10 = vcmp.eq.f32.partialorder %v557_v49, 8.507059e+37 }
 0x140   : > { %v733_v38 = vpop.eup %732 }
 0x141   : > { %v735_v39 = vpop.eup %734  ;;  %v535_v40 = vmul.f32 %v733_v38, %v532_v36  ;;  %vm540_vm3 = vweird.f32 %v733_v38 }
 0x142   : > { %v549_v41 = vmul.f32 %v735_v39, %v533_v37  ;;  %vm554_vm4 = vweird.f32 %v735_v39  ;;  %vm541_vm6 = vmor %vm539_vm5, %vm540_vm3 }
 0x143   : > { %v536_v42 = vsub.f32 1.0, %v535_v40  ;;  %vm555_vm8 = vmor %vm553_vm7, %vm554_vm4 }
 0x144   : > { %v550_v43 = vsub.f32 1.0, %v549_v41 }
 0x145   : > { %v537_v44 = vmul.f32 %v733_v38, %v536_v42 }
 0x146   : > { %v551_v48 = vmul.f32 %v735_v39, %v550_v43 }
 0x147   : > { %v538_v50 = vadd.f32 %v733_v38, %v537_v44 }
 0x148   : > { %v552_v51 = vadd.f32 %v735_v39, %v551_v48 }
 0x149   : > { %v542_v52 = vsel %vm541_vm6, %v733_v38, %v538_v50 }
 0x14a   : > { %v556_v55 = vsel %vm555_vm8, %v735_v39, %v552_v51  ;;  %v547_v56 = vsel %vm544_vm9, %v546_v53, %v542_v52 }
 0x14b   : > { %v561_v57 = vsel %vm558_vm10, %v560_v54, %v556_v55  ;;  %v562_v59 = vperm.slane %v547_v56, 0 }
 0x14c   : > { %v563_v58 = vperm.slane %v561_v57, 0 }
 0x14e   : > { %v566_v60 = vrot.slane %v563_v58, 4 }
 0x150   : > { %v567_v61 = vsel %vm368_vm0, %v562_v59, %v566_v60 }
 0x151   : > { %v569_v62 = vmul.f32 %v567_v61, %v831_v3 }
 0x153   : > { %570 = vst [vmem:[%s354_s23] sm:$0xff] %v569_v62 }
 0x154 PF: > { %s19_s28 = sadd.s32 1, %s758_s28   ;;  %s874_s26 = smov %s754_s27 }
 0x155   : > { %p16_p5 = scmp.ge.s32.totalorder %s19_s28, 4   ;;  %s875_s27 = smov %s877_s6 }
 0x157   :  { %18 = sbr.rel (!%p16_p5) target bundleno = 3 (0x3), region = 81 }

</bundles_post_ra>
